<compile_context>
chip_gen: v5e
topology: v5e:2x2
jax: 0.10.0
libtpu: 0.0.40
codegen_flags: <defaults>
</compile_context>

<pallas_src>
import jax
import jax.numpy as jnp
from jax import lax
from jax.experimental import pallas as pl
from jax.experimental.pallas import tpu as pltpu


# ----------------------------------------------------------------------------
# Kernels
# ----------------------------------------------------------------------------
def _layernorm_kernel(x_ref, w_ref, b_ref, o_ref):
    """Plain path: per-row LayerNorm over the last (lane) dim."""
    x = x_ref[...].astype(jnp.float32)          # no-op for f32 inputs
    inv_h = jnp.float32(1.0 / x.shape[-1])
    mu = jnp.sum(x, axis=-1, keepdims=True) * inv_h
    d = x - mu
    # Two-pass variance (torch parity, avoids E[x^2]-mu^2 cancellation).
    var = jnp.sum(d * d, axis=-1, keepdims=True) * inv_h
    inv = lax.rsqrt(var + 1e-5)
    o_ref[...] = (d * inv * w_ref[...] + b_ref[...]).astype(o_ref.dtype)


def _layernorm_packed_kernel(x_ref, w_ref, b_ref, dmat_ref, dmat_t_ref, o_ref):
    """Lane-dense path for small hidden.

    k = 128 // H original rows are packed into one (k*H)-wide row so HBM
    loads/stores are full-lane.  dmat is a (k*H, k) block-diagonal 0/1 matrix:
    x @ dmat gives per-segment sums on the idle MXU; (stat) @ dmat_t
    broadcasts per-segment stats back across each H-length segment.
    """
    x = x_ref[...].astype(jnp.float32)          # (TR, K*H)
    dmat = dmat_ref[...]                        # (K*H, K)
    dmat_t = dmat_t_ref[...]                    # (K, K*H)
    seg = dmat.shape[0] // dmat.shape[1]        # = H
    inv_h = jnp.float32(1.0 / seg)

    s1 = jnp.dot(x, dmat, preferred_element_type=jnp.float32)            # (TR, K)
    mu_seg = s1 * inv_h
    mu = jnp.dot(mu_seg, dmat_t, preferred_element_type=jnp.float32)     # (TR, K*H)
    d = x - mu
    s2 = jnp.dot(d * d, dmat, preferred_element_type=jnp.float32)        # (TR, K)
    inv_seg = lax.rsqrt(s2 * inv_h + 1e-5)
    inv = jnp.dot(inv_seg, dmat_t, preferred_element_type=jnp.float32)   # (TR, K*H)
    o_ref[...] = (d * inv * w_ref[...] + b_ref[...]).astype(o_ref.dtype)


# ----------------------------------------------------------------------------
# Tiling / VMEM configuration
# ----------------------------------------------------------------------------
def _vmem_config():
    """Generation-aware (budget_bytes, vmem_limit_bytes, two_tensorcores)."""
    try:
        cap = int(pltpu.get_tpu_info().vmem_capacity_bytes)
    except Exception:  # pragma: no cover - conservative fallback (v7x-safe)
        cap = 64 * 1024 * 1024
    if cap >= 100 * 1024 * 1024:
        # v5e / v6e: 128 MiB VMEM, single TensorCore.
        return 56 * 1024 * 1024, 96 * 1024 * 1024, False
    # v7x: 64 MiB per-TC VMEM, 2 TensorCores; leave ~8 MiB headroom.
    return 44 * 1024 * 1024, 56 * 1024 * 1024, True


def _choose_tile_rows(rows, hidden, dtype, budget, two_cores):
    """Largest row tile fitting the VMEM byte budget (bytes-based, no row cap)."""
    itemsize = jnp.dtype(dtype).itemsize
    sublane = {4: 8, 2: 16, 1: 32}.get(itemsize, 8)
    # Double-buffered input + output blocks, plus f32 temporaries in the body
    # (the .astype(f32) copy only materializes for sub-f32 inputs).
    n_tmp = 2 if itemsize == 4 else 3
    bytes_per_row = hidden * (2 * itemsize + 2 * itemsize + n_tmp * 4)
    tr = int(budget // max(bytes_per_row, 1))

    if tr >= rows:
        tr = rows                                    # single full-extent block (always legal)
    else:
        tr = max(sublane, (tr // sublane) * sublane)

    if two_cores and rows >= 2 * sublane:
        # v7x: keep an even number of grid steps so both TensorCores get
        # balanced work (the single grid axis is sharded across the 2 TCs).
        steps = pl.cdiv(rows, tr)
        if steps % 2 == 1:                           # includes steps == 1
            cand = -(-rows // (steps + 1))
            cand = max(sublane, ((cand + sublane - 1) // sublane) * sublane)
            if cand < rows and pl.cdiv(rows, cand) % 2 == 0:
                tr = cand
    return tr


# ----------------------------------------------------------------------------
# Wrapper
# ----------------------------------------------------------------------------
def withbias_layernorm(x, weight, bias, *, tile_rows=None):
    """LayerNorm-with-bias over the last dim of x (any leading shape)."""
    orig_shape = x.shape
    hidden = orig_shape[-1]
    x2 = x.reshape(-1, hidden)
    rows = x2.shape[0]

    budget, vmem_limit, two_cores = _vmem_config()

    # Lane-dense repack for small hidden (no-op for H that is already a
    # multiple of 128): contiguous, free reshape in the wrapper.
    pack = 1
    if hidden < 128 and 128 % hidden == 0:
        k = 128 // hidden
        if rows % k == 0 and rows >= k:
            pack = k

    w1 = weight.reshape(-1).astype(jnp.float32)
    b1 = bias.reshape(-1).astype(jnp.float32)

    if pack > 1:
        kh = pack * hidden
        x2 = x2.reshape(rows // pack, kh)
        w2 = jnp.tile(w1, pack).reshape(1, kh)
        b2 = jnp.tile(b1, pack).reshape(1, kh)
        seg_id = jnp.arange(kh, dtype=jnp.int32) // hidden
        dmat = (seg_id[:, None]
                == jnp.arange(pack, dtype=jnp.int32)[None, :]).astype(jnp.float32)
        dmat_t = dmat.T
    else:
        w2 = w1.reshape(1, hidden)
        b2 = b1.reshape(1, hidden)

    prows, phid = x2.shape
    if tile_rows is None:
        tile_rows = _choose_tile_rows(prows, phid, x.dtype, budget, two_cores)

    grid = (pl.cdiv(prows, tile_rows),)   # trailing partial block is masked by Pallas

    x_spec = pl.BlockSpec((tile_rows, phid), lambda i: (i, 0))
    o_spec = pl.BlockSpec((tile_rows, phid), lambda i: (i, 0))
    p_spec = pl.BlockSpec((1, phid), lambda i: (0, 0))

    cparams = pltpu.CompilerParams(
        dimension_semantics=("parallel",),
        vmem_limit_bytes=vmem_limit,
    )

    if pack > 1:
        d_spec = pl.BlockSpec((phid, pack), lambda i: (0, 0))
        dt_spec = pl.BlockSpec((pack, phid), lambda i: (0, 0))
        out = pl.pallas_call(
            _layernorm_packed_kernel,
            out_shape=jax.ShapeDtypeStruct((prows, phid), x.dtype),
            grid_spec=pltpu.PrefetchScalarGridSpec(
                num_scalar_prefetch=0,
                grid=grid,
                in_specs=[x_spec, p_spec, p_spec, d_spec, dt_spec],
                out_specs=o_spec,
            ),
            compiler_params=cparams,
        )(x2, w2, b2, dmat, dmat_t)
    else:
        out = pl.pallas_call(
            _layernorm_kernel,
            out_shape=jax.ShapeDtypeStruct((prows, phid), x.dtype),
            grid_spec=pltpu.PrefetchScalarGridSpec(
                num_scalar_prefetch=0,
                grid=grid,
                in_specs=[x_spec, p_spec, p_spec],
                out_specs=o_spec,
            ),
            compiler_params=cparams,
        )(x2, w2, b2)

    return out.reshape(orig_shape)


# ----------------------------------------------------------------------------
# Demo / correctness check
# ----------------------------------------------------------------------------
def _reference(x, weight, bias):
    mu = jnp.mean(x, axis=-1, keepdims=True)
    var = jnp.mean((x - mu) ** 2, axis=-1, keepdims=True)
    return (x - mu) / jnp.sqrt(var + 1e-5) * weight + bias


if __name__ == "__main__":
    key = jax.random.PRNGKey(0)
    k0, k1, k2, k3 = jax.random.split(key, 4)

    # --- module-default params (ones / zeros), small hidden -> packed path ---
    batch, seq, hidden = 2, 8, 32
    x = jax.random.normal(k0, (batch, seq, hidden), dtype=jnp.float32)
    weight = jnp.ones((hidden,), dtype=jnp.float32)
    bias = jnp.zeros((hidden,), dtype=jnp.float32)
    y = jax.block_until_ready(withbias_layernorm(x, weight, bias))
    assert jnp.allclose(y, _reference(x, weight, bias), atol=1e-4, rtol=1e-4), \
        "mismatch vs reference (default params)"

    # --- non-trivial weight/bias exercise the tiled-parameter path ---
    w_r = jax.random.normal(k1, (hidden,), dtype=jnp.float32)
    b_r = jax.random.normal(k2, (hidden,), dtype=jnp.float32)
    y2 = jax.block_until_ready(withbias_layernorm(x, w_r, b_r))
    assert jnp.allclose(y2, _reference(x, w_r, b_r), atol=1e-4, rtol=1e-4), \
        "mismatch vs reference (random params)"

    # --- hidden that is already a multiple of 128 -> plain lane-dense path ---
    hidden2 = 256
    x3 = jax.random.normal(k3, (batch, seq, hidden2), dtype=jnp.float32)
    w3 = jnp.ones((hidden2,), dtype=jnp.float32)
    b3 = jnp.zeros((hidden2,), dtype=jnp.float32)
    y3 = jax.block_until_ready(withbias_layernorm(x3, w3, b3))
    assert jnp.allclose(y3, _reference(x3, w3, b3), atol=1e-4, rtol=1e-4), \
        "mismatch vs reference (hidden=256)"

    print("KERNEL_OK")
</pallas_src>

<mosaic_0001>
module attributes {stable_mosaic.version = 11 : i64} {
  func.func @_layernorm_packed_kernel(%arg0: i32, %arg1: memref<4x128xf32, #tpu.memory_space<vmem>>, %arg2: memref<1x128xf32, #tpu.memory_space<vmem>>, %arg3: memref<1x128xf32, #tpu.memory_space<vmem>>, %arg4: memref<128x4xf32, #tpu.memory_space<vmem>>, %arg5: memref<4x128xf32, #tpu.memory_space<vmem>>, %arg6: memref<4x128xf32, #tpu.memory_space<vmem>>) attributes {dimension_semantics = [#tpu.dimension_semantics<parallel>], iteration_bounds = array<i64: 1>, scalar_prefetch = 0 : i64, scratch_operands = 0 : i64, tpu.core_type = #tpu.core_type<tc>, window_params = [{transform_indices = @transform_0, window_bounds = array<i64: 4, 128>}, {pipeline_mode = #tpu.pipeline_mode<synchronous>, transform_indices = @transform_1, window_bounds = array<i64: 1, 128>}, {pipeline_mode = #tpu.pipeline_mode<synchronous>, transform_indices = @transform_2, window_bounds = array<i64: 1, 128>}, {pipeline_mode = #tpu.pipeline_mode<synchronous>, transform_indices = @transform_3, window_bounds = array<i64: 128, 4>}, {pipeline_mode = #tpu.pipeline_mode<synchronous>, transform_indices = @transform_4, window_bounds = array<i64: 4, 128>}, {transform_indices = @transform_5, window_bounds = array<i64: 4, 128>}]} {
    %c0 = arith.constant 0 : index
    %c0_0 = arith.constant 0 : index
    %0 = vector.load %arg1[%c0, %c0_0] : memref<4x128xf32, #tpu.memory_space<vmem>>, vector<4x128xf32>
    %c0_1 = arith.constant 0 : index
    %c0_2 = arith.constant 0 : index
    %1 = vector.load %arg4[%c0_1, %c0_2] : memref<128x4xf32, #tpu.memory_space<vmem>>, vector<128x4xf32>
    %c0_3 = arith.constant 0 : index
    %c0_4 = arith.constant 0 : index
    %2 = vector.load %arg5[%c0_3, %c0_4] : memref<4x128xf32, #tpu.memory_space<vmem>>, vector<4x128xf32>
    %cst = arith.constant dense<0.000000e+00> : vector<4x4xf32>
    %3 = tpu.matmul %0, %1, %cst {dimension_numbers = #tpu.dot_dimension_numbers<[1], [0], [0], [1], [0, 0, 1, 1], [], []>} : vector<4x128xf32>, vector<128x4xf32>, vector<4x4xf32> -> vector<4x4xf32>
    %cst_5 = arith.constant 3.125000e-02 : f32
    %4 = vector.broadcast %cst_5 : f32 to vector<4x4xf32>
    %5 = arith.mulf %3, %4 : vector<4x4xf32>
    %cst_6 = arith.constant dense<0.000000e+00> : vector<4x128xf32>
    %6 = tpu.matmul %5, %2, %cst_6 {dimension_numbers = #tpu.dot_dimension_numbers<[1], [0], [0], [1], [0, 0, 1, 1], [], []>} : vector<4x4xf32>, vector<4x128xf32>, vector<4x128xf32> -> vector<4x128xf32>
    %7 = arith.subf %0, %6 : vector<4x128xf32>
    %8 = arith.mulf %7, %7 : vector<4x128xf32>
    %cst_7 = arith.constant dense<0.000000e+00> : vector<4x4xf32>
    %9 = tpu.matmul %8, %1, %cst_7 {dimension_numbers = #tpu.dot_dimension_numbers<[1], [0], [0], [1], [0, 0, 1, 1], [], []>} : vector<4x128xf32>, vector<128x4xf32>, vector<4x4xf32> -> vector<4x4xf32>
    %cst_8 = arith.constant 3.125000e-02 : f32
    %10 = vector.broadcast %cst_8 : f32 to vector<4x4xf32>
    %11 = arith.mulf %9, %10 : vector<4x4xf32>
    %cst_9 = arith.constant 9.99999974E-6 : f32
    %12 = vector.broadcast %cst_9 : f32 to vector<4x4xf32>
    %13 = arith.addf %11, %12 : vector<4x4xf32>
    %14 = math.rsqrt %13 : vector<4x4xf32>
    %cst_10 = arith.constant dense<0.000000e+00> : vector<4x128xf32>
    %15 = tpu.matmul %14, %2, %cst_10 {dimension_numbers = #tpu.dot_dimension_numbers<[1], [0], [0], [1], [0, 0, 1, 1], [], []>} : vector<4x4xf32>, vector<4x128xf32>, vector<4x128xf32> -> vector<4x128xf32>
    %16 = arith.mulf %7, %15 : vector<4x128xf32>
    %c0_11 = arith.constant 0 : index
    %c0_12 = arith.constant 0 : index
    %17 = vector.load %arg2[%c0_11, %c0_12] : memref<1x128xf32, #tpu.memory_space<vmem>>, vector<1x128xf32>
    %18 = vector.broadcast %17 : vector<1x128xf32> to vector<4x128xf32>
    %19 = arith.mulf %16, %18 : vector<4x128xf32>
    %c0_13 = arith.constant 0 : index
    %c0_14 = arith.constant 0 : index
    %20 = vector.load %arg3[%c0_13, %c0_14] : memref<1x128xf32, #tpu.memory_space<vmem>>, vector<1x128xf32>
    %21 = vector.broadcast %20 : vector<1x128xf32> to vector<4x128xf32>
    %22 = arith.addf %19, %21 : vector<4x128xf32>
    %c0_15 = arith.constant 0 : index
    %c0_16 = arith.constant 0 : index
    %23 = vector.load %arg6[%c0_15, %c0_16] : memref<4x128xf32, #tpu.memory_space<vmem>>, vector<4x128xf32>
    tpu.vector_store %arg6[%c0_15, %c0_16], %22 {strides = array<i32>} : memref<4x128xf32, #tpu.memory_space<vmem>>, vector<4x128xf32>,
    return
  }
  func.func @transform_0(%arg0: i32) -> (i32, i32) {
    %c0_i32 = arith.constant 0 : i32
    %c0_i32_0 = arith.constant 0 : i32
    return %arg0, %c0_i32 : i32, i32
  }
  func.func @transform_1(%arg0: i32) -> (i32, i32) {
    %c0_i32 = arith.constant 0 : i32
    %c0_i32_0 = arith.constant 0 : i32
    %c0_i32_1 = arith.constant 0 : i32
    return %c0_i32, %c0_i32_0 : i32, i32
  }
  func.func @transform_2(%arg0: i32) -> (i32, i32) {
    %c0_i32 = arith.constant 0 : i32
    %c0_i32_0 = arith.constant 0 : i32
    %c0_i32_1 = arith.constant 0 : i32
    return %c0_i32, %c0_i32_0 : i32, i32
  }
  func.func @transform_3(%arg0: i32) -> (i32, i32) {
    %c0_i32 = arith.constant 0 : i32
    %c0_i32_0 = arith.constant 0 : i32
    %c0_i32_1 = arith.constant 0 : i32
    return %c0_i32, %c0_i32_0 : i32, i32
  }
  func.func @transform_4(%arg0: i32) -> (i32, i32) {
    %c0_i32 = arith.constant 0 : i32
    %c0_i32_0 = arith.constant 0 : i32
    %c0_i32_1 = arith.constant 0 : i32
    return %c0_i32, %c0_i32_0 : i32, i32
  }
  func.func @transform_5(%arg0: i32) -> (i32, i32) {
    %c0_i32 = arith.constant 0 : i32
    %c0_i32_0 = arith.constant 0 : i32
    return %arg0, %c0_i32 : i32, i32
  }
}

</mosaic_0001>

<bundles_post_ra>
// kernel: tpu_custom_call.1
= control target key start
LH: loop header
LB: loop body
LE: loop exit
PB: predicated region body
PF: predicated region fallthrough
CT: control target
= control target key end

     0   :  { %s304_s0 = inlined_call_operand.vmem [shape: f32[4,128], index: 0, kind: input, shape index: {}]   ;;  %s305_s1 = inlined_call_operand.vmem [shape: f32[1,128], index: 1, kind: input, shape index: {}]   ;;  %s306_s2 = inlined_call_operand.vmem [shape: f32[1,128], index: 2, kind: input, shape index: {}]   ;;  %s307_s3 = inlined_call_operand.vmem [shape: f32[128,4], index: 3, kind: input, shape index: {}]   ;;  %s308_s4 = inlined_call_operand.vmem [shape: f32[4,128], index: 4, kind: input, shape index: {}]   ;;  %s309_s5 = inlined_call_operand.hbm [shape: f32[4,128], index: 5, kind: output, shape index: {}]  }
   0x1   :  { %v37_v0 = vld [vmem:[%s307_s3 + $0x78] sm:$0xff]  ;;  %v36_v1 = vld [vmem:[%s307_s3 + $0x70] sm:$0xff]  ;;  %v35_v2 = vld [vmem:[%s307_s3 + $0x68] sm:$0xff] }
   0x2   :  { %39 = vmatpush.msra.mxu0 %v37_v0  ;;  %90 = vmatpush.msra.mxu2 %v37_v0  ;;  %v34_v3 = vld [vmem:[%s307_s3 + $0x60] sm:$0xff]  ;;  %v33_v4 = vld [vmem:[%s307_s3 + $0x58] sm:$0xff] }
   0x4   :  { %40 = vmatpush.msra.mxu0 %v36_v1  ;;  %91 = vmatpush.msra.mxu2 %v36_v1 }
   0x6   :  { %41 = vmatpush.msra.mxu0 %v35_v2  ;;  %92 = vmatpush.msra.mxu2 %v35_v2 }
   0x7   :  { %10 = vsyncpa [#allocation3], 0  ;;  %v32_v5 = vld [vmem:[%s307_s3 + $0x50] sm:$0xff]  ;;  %v31_v6 = vld [vmem:[%s307_s3 + $0x48] sm:$0xff]  ;;  %vm64_vm0 = vcmask 1043456   ;;  %vm60_vm1 = vcmask 31744  }
   0x8   :  { %42 = vmatpush.msra.mxu0 %v34_v3  ;;  %93 = vmatpush.msra.mxu2 %v34_v3  ;;  %v30_v7 = vld [vmem:[%s307_s3 + $0x40] sm:$0xff]  ;;  %v29_v8 = vld [vmem:[%s307_s3 + $0x38] sm:$0xff]  ;;  %v28_v9 = vld [vmem:[%s307_s3 + $0x30] sm:$0xff]  ;;  %s208_s30 = smov [#allocation2]   ;;  %s164_s9 = sshll.u32 %s309_s5, 4  ;;  %s165_s9 = int_to_ptr.hbm [resolvable:$true] %s164_s9 }
   0x9   :  { %v27_v10 = vld [vmem:[%s307_s3 + $0x28] sm:$0xff]  ;;  %v26_v11 = vld [vmem:[%s307_s3 + $0x20] sm:$0xff]  ;;  %v25_v12 = vld [vmem:[%s307_s3 + $0x18] sm:$0xff]  ;;  %s162_s6 = sshll.u32 %s208_s30, 4  ;;  %s163_s6 = int_to_ptr.vmem [resolvable:$true] %s162_s6 }
   0xa   :  { %43 = vmatpush.msra.mxu0 %v33_v4  ;;  %94 = vmatpush.msra.mxu2 %v33_v4  ;;  %v24_v13 = vld [vmem:[%s307_s3 + $0x10] sm:$0xff]  ;;  %v23_v14 = vld [vmem:[%s307_s3 + $0x8] sm:$0xff]  ;;  %v22_v15 = vld [vmem:[%s307_s3] sm:$0xff] }
   0xb   :  { %v21_v16 = vld [vmem:[%s304_s0] sm:$0xf] }
   0xc   :  { %44 = vmatpush.msra.mxu0 %v32_v5  ;;  %95 = vmatpush.msra.mxu2 %v32_v5  ;;  %v38_v17 = vld [vmem:[%s308_s4] sm:$0xf] }
   0xd   :  { %173 = vmatpush.msk.msra.mxu1 %vm64_vm0, %v38_v17  ;;  %175 = vmatpush.msk.msra.mxu3 %vm64_vm0, %v38_v17  ;;  %v178_v33 = vld [vmem:[%s305_s1] ss:$0 sm:$0xff] }
   0xe   :  { %45 = vmatpush.msra.mxu0 %v31_v6  ;;  %96 = vmatpush.msra.mxu2 %v31_v6  ;;  %v179_v36 = vld [vmem:[%s306_s2] ss:$0 sm:$0xff] }
  0x10   :  { %46 = vmatpush.msra.mxu0 %v30_v7  ;;  %97 = vmatpush.msra.mxu2 %v30_v7 }
  0x12   :  { %47 = vmatpush.msra.mxu0 %v29_v8  ;;  %98 = vmatpush.msra.mxu2 %v29_v8 }
  0x14   :  { %48 = vmatpush.msra.mxu0 %v28_v9  ;;  %99 = vmatpush.msra.mxu2 %v28_v9 }
  0x16   :  { %49 = vmatpush.msra.mxu0 %v27_v10  ;;  %100 = vmatpush.msra.mxu2 %v27_v10 }
  0x18   :  { %50 = vmatpush.msra.mxu0 %v26_v11  ;;  %101 = vmatpush.msra.mxu2 %v26_v11 }
  0x1a   :  { %51 = vmatpush.msra.mxu0 %v25_v12  ;;  %102 = vmatpush.msra.mxu2 %v25_v12 }
  0x1c   :  { %52 = vmatpush.msra.mxu0 %v24_v13  ;;  %103 = vmatpush.msra.mxu2 %v24_v13 }
  0x1e   :  { %53 = vmatpush.msra.mxu0 %v23_v14  ;;  %104 = vmatpush.msra.mxu2 %v23_v14 }
  0x20   :  { %54 = vmatpush.msra.mxu0 %v22_v15  ;;  %105 = vmatpush.msra.mxu2 %v22_v15 }
  0x21   :  { %55 = vmatmul.f32.vlgmr.msra.gmra.mxu0 %v21_v16 }
  0x9e   :  { %v56_v18 = vpop.f32.mrf.mxu0 }
  0x9f   :  { %v59_v19 = vmul.f32 0.03125, %v56_v18 }
  0xa1   :  { %174 = vmatmul.msk.f32.vlgmr.msra.gmra.mxu1 %vm60_vm1, %v59_v19 }
 0x11e   :  { %v85_v20 = vpop.f32.mrf.mxu1 }
 0x11f   :  { %v88_v21 = vsub.f32 %v21_v16, %v85_v20 }
 0x121   :  { %v89_v22 = vmul.f32 %v88_v21, %v88_v21 }
 0x123   :  { %106 = vmatmul.f32.vlgmr.msra.gmra.mxu2 %v89_v22 }
 0x1a6   :  { %v107_v23 = vpop.f32.mrf.mxu2 }
 0x1a7   :  { %v110_v24 = vmul.f32 0.03125, %v107_v23 }
 0x1a9   :  { %v111_v25 = vadd.f32 1e-05, %v110_v24 }
 0x1ab   :  { %180 = vrsqrt.f32 %v111_v25  ;;  %vm118_vm3 = vweird.f32 %v111_v25 }
 0x1b1   :  { %v181_v26 = vpop.eup %180 }
 0x1b2   :  { %v113_v27 = vmul.f32 %v181_v26, %v111_v25  ;;  %vm119_vm2 = vweird.f32 %v181_v26 }
 0x1b3   :  { %vm120_vm4 = vmor %vm118_vm3, %vm119_vm2 }
 0x1b4   :  { %v114_v28 = vmul.f32 %v181_v26, %v113_v27 }
 0x1b6   :  { %v115_v29 = vmul.f32 0.5, %v114_v28 }
 0x1b8   :  { %v116_v30 = vsub.f32 1.5, %v115_v29 }
 0x1ba   :  { %v117_v31 = vmul.f32 %v181_v26, %v116_v30 }
 0x1bc   :  { %v121_v32 = vsel %vm120_vm4, %v181_v26, %v117_v31 }
 0x1bd   :  { %176 = vmatmul.msk.f32.vlgmr.msra.gmra.mxu3 %vm60_vm1, %v121_v32 }
 0x240   :  { %v142_v34 = vpop.f32.mrf.mxu3 }
 0x241   :  { %v145_v35 = vmul.f32 %v142_v34, %v88_v21 }
 0x243   :  { %v150_v37 = vmul.f32 %v178_v33, %v145_v35 }
 0x245   :  { %v155_v38 = vadd.f32 %v179_v36, %v150_v37 }
 0x247   :  { %156 = vst [vmem:[#allocation2] sm:$0xf] %v155_v38 }
 0x248   :  { %167 = dma.vmem_to_hbm [thread:$0]  %s163_s6, 64, %s165_s9, [#allocation3]  }
 0x249   :  { %206 = dma.done.wait [#allocation3], 64  }
 0x24a   :  { %207 = vsyncadd [#allocation3], 4294967232 }
 0x24b   :  { %172 = vsyncpa [#allocation3], 1 }

</bundles_post_ra>
